<compile_context>
chip_gen: v6e
topology: v6e:2x2x1
jax: 0.10.0
libtpu: 0.0.40
codegen_flags: <defaults>
</compile_context>

<pallas_src>
import functools

import jax
import jax.numpy as jnp
from jax.experimental import pallas as pl
from jax.experimental.pallas import tpu as pltpu


def _conv2d_kernel(x_ref, w_ref, b_ref, o_ref, *, tap_offsets, hw, pad):
    """Direct conv as one im2col matmul per batch element.

    x_ref: (N, Cin, H*W)        VMEM  (lane-dense spatial axis)
    w_ref: (Cout, KH*KW*Cin)    VMEM  (columns tap-major, Cin minor)
    b_ref: (Cout, 1)            VMEM
    o_ref: (N, Cout, H*W)       VMEM  (output in the input spatial frame; only
                                       lanes h*W+w with h<Hout, w<Wout are valid)
    """
    n_batch, cin, _ = x_ref.shape

    xin = x_ref[...]
    if pad > 0:
        # Zero tail so every tap can read a full H*W-wide lane window.
        xin = jnp.concatenate(
            [xin, jnp.zeros((n_batch, cin, pad), xin.dtype)], axis=-1)

    w2 = w_ref[...].astype(jnp.float32)            # (Cout, KH*KW*Cin)
    b = b_ref[...].astype(jnp.float32)             # (Cout, 1) -> lane broadcast

    for nb in range(n_batch):                      # N is tiny and static
        xb = xin[nb]                               # (Cin, H*W + pad)
        # im2col: row (t*Cin + ci) = input channel ci shifted by tap offset s_t.
        cols = jnp.concatenate(
            [xb[:, s:s + hw] for s in tap_offsets], axis=0)   # (KH*KW*Cin, H*W)
        y = jnp.dot(w2, cols.astype(jnp.float32),
                    preferred_element_type=jnp.float32) + b   # (Cout, H*W)
        o_ref[nb] = y.astype(o_ref.dtype)          # full-width (256-lane) store


@jax.jit
def conv2d_pallas(x_nchw, weight_oihw, bias):
    """Conv2d, stride=1, padding=0. x: (N, Cin, H, W); weight: (Cout, Cin, KH, KW)."""
    n, cin, h, w = x_nchw.shape
    cout, cin_w, kh, kw = weight_oihw.shape
    assert cin == cin_w
    h_out = h - kh + 1
    w_out = w - kw + 1
    hw = h * w

    # Free reshape only (row-major collapse): no HBM transpose of x.
    x_flat = x_nchw.reshape(n, cin, hw)
    # One-time parameter plumbing (648 bytes): column k = t*Cin + ci must match
    # the row order of the in-kernel patch matrix (tap-major, Cin minor).
    w2 = jnp.transpose(weight_oihw, (0, 2, 3, 1)).reshape(cout, kh * kw * cin)
    b_col = bias.reshape(cout, 1)

    # Tap t = (i, j) reads input lane p + i*W + j for output lane p.
    tap_offsets = tuple(i * w + j for i in range(kh) for j in range(kw))
    kernel = functools.partial(_conv2d_kernel, tap_offsets=tap_offsets,
                               hw=hw, pad=max(tap_offsets))

    out_full = pl.pallas_call(
        kernel,
        out_shape=jax.ShapeDtypeStruct((n, cout, hw), x_nchw.dtype),
        in_specs=[pl.BlockSpec(memory_space=pltpu.MemorySpace.VMEM)] * 3,
        out_specs=pl.BlockSpec(memory_space=pltpu.MemorySpace.VMEM),
    )(x_flat, w2, b_col)

    # Output pixel (ho, wo) lives at lane ho*W + wo of the input-frame slab:
    # free reshape + cheap slice recovers NCHW (N, Cout, Hout, Wout).
    return out_full.reshape(n, cout, h, w)[:, :, :h_out, :w_out]


if __name__ == "__main__":
    key = jax.random.PRNGKey(0)
    k_x, k_w, k_b = jax.random.split(key, 3)

    # Small shapes consistent with Conv2d(3 -> 6, k=3): N=2, Cin=3, H=W=16.
    N, CIN, H, W = 2, 3, 16, 16
    COUT, KH, KW = 6, 3, 3

    x = jax.random.normal(k_x, (N, CIN, H, W), dtype=jnp.float32)
    # Deterministic synthetic parameters (PyTorch-style uniform init bound).
    bound = 1.0 / (CIN * KH * KW) ** 0.5
    weight = jax.random.uniform(k_w, (COUT, CIN, KH, KW), jnp.float32, -bound, bound)
    bias = jax.random.uniform(k_b, (COUT,), jnp.float32, -bound, bound)

    out = conv2d_pallas(x, weight, bias)
    out = jax.block_until_ready(out)

    # Reference check against XLA conv (NCHW / OIHW, VALID padding).
    ref = jax.lax.conv_general_dilated(
        x, weight, window_strides=(1, 1), padding="VALID",
        dimension_numbers=("NCHW", "OIHW", "NCHW")) + bias.reshape(1, COUT, 1, 1)
    assert out.shape == (N, COUT, H - KH + 1, W - KW + 1)
    assert jnp.allclose(out, ref, atol=2e-5, rtol=2e-5)

    print("KERNEL_OK")
</pallas_src>

<mosaic_0001>
module attributes {stable_mosaic.version = 11 : i64} {
  func.func @_conv2d_kernel(%arg0: memref<2x3x256xf32, #tpu.memory_space<vmem>>, %arg1: memref<6x27xf32, #tpu.memory_space<vmem>>, %arg2: memref<6x1xf32, #tpu.memory_space<vmem>>, %arg3: memref<2x6x256xf32, #tpu.memory_space<vmem>>) attributes {dimension_semantics = [], scalar_prefetch = 0 : i64, scratch_operands = 0 : i64, tpu.core_type = #tpu.core_type<tc>} {
    %c0 = arith.constant 0 : index
    %c0_0 = arith.constant 0 : index
    %c0_1 = arith.constant 0 : index
    %0 = vector.load %arg0[%c0, %c0_0, %c0_1] : memref<2x3x256xf32, #tpu.memory_space<vmem>>, vector<2x3x256xf32>
    %cst = arith.constant 0.000000e+00 : f32
    %1 = vector.broadcast %cst : f32 to vector<2x3x34xf32>
    %2 = tpu.concatenate %0, %1 in 2 : vector<2x3x256xf32>, vector<2x3x34xf32> -> vector<2x3x290xf32>
    %c0_2 = arith.constant 0 : index
    %c0_3 = arith.constant 0 : index
    %3 = vector.load %arg1[%c0_2, %c0_3] : memref<6x27xf32, #tpu.memory_space<vmem>>, vector<6x27xf32>
    %c0_4 = arith.constant 0 : index
    %c0_5 = arith.constant 0 : index
    %4 = vector.load %arg2[%c0_4, %c0_5] : memref<6x1xf32, #tpu.memory_space<vmem>>, vector<6x1xf32>
    %5 = vector.extract_strided_slice %2 {offsets = [0, 0, 0], sizes = [1, 3, 290], strides = [1, 1, 1]} : vector<2x3x290xf32> to vector<1x3x290xf32>
    %6 = vector.shape_cast %5 : vector<1x3x290xf32> to vector<3x290xf32>
    %7 = vector.extract_strided_slice %6 {offsets = [0, 0], sizes = [3, 256], strides = [1, 1]} : vector<3x290xf32> to vector<3x256xf32>
    %8 = vector.extract_strided_slice %6 {offsets = [0, 1], sizes = [3, 256], strides = [1, 1]} : vector<3x290xf32> to vector<3x256xf32>
    %9 = vector.extract_strided_slice %6 {offsets = [0, 2], sizes = [3, 256], strides = [1, 1]} : vector<3x290xf32> to vector<3x256xf32>
    %10 = vector.extract_strided_slice %6 {offsets = [0, 16], sizes = [3, 256], strides = [1, 1]} : vector<3x290xf32> to vector<3x256xf32>
    %11 = vector.extract_strided_slice %6 {offsets = [0, 17], sizes = [3, 256], strides = [1, 1]} : vector<3x290xf32> to vector<3x256xf32>
    %12 = vector.extract_strided_slice %6 {offsets = [0, 18], sizes = [3, 256], strides = [1, 1]} : vector<3x290xf32> to vector<3x256xf32>
    %13 = vector.extract_strided_slice %6 {offsets = [0, 32], sizes = [3, 256], strides = [1, 1]} : vector<3x290xf32> to vector<3x256xf32>
    %14 = vector.extract_strided_slice %6 {offsets = [0, 33], sizes = [3, 256], strides = [1, 1]} : vector<3x290xf32> to vector<3x256xf32>
    %15 = vector.extract_strided_slice %6 {offsets = [0, 34], sizes = [3, 256], strides = [1, 1]} : vector<3x290xf32> to vector<3x256xf32>
    %16 = tpu.concatenate %7, %8, %9, %10, %11, %12, %13, %14, %15 in 0 : vector<3x256xf32>, vector<3x256xf32>, vector<3x256xf32>, vector<3x256xf32>, vector<3x256xf32>, vector<3x256xf32>, vector<3x256xf32>, vector<3x256xf32>, vector<3x256xf32> -> vector<27x256xf32>
    %cst_6 = arith.constant dense<0.000000e+00> : vector<6x256xf32>
    %17 = tpu.matmul %3, %16, %cst_6 {dimension_numbers = #tpu.dot_dimension_numbers<[1], [0], [0], [1], [0, 0, 1, 1], [], []>} : vector<6x27xf32>, vector<27x256xf32>, vector<6x256xf32> -> vector<6x256xf32>
    %18 = vector.broadcast %4 : vector<6x1xf32> to vector<6x256xf32>
    %19 = arith.addf %17, %18 : vector<6x256xf32>
    %c0_7 = arith.constant 0 : index
    %c0_8 = arith.constant 0 : index
    %c0_9 = arith.constant 0 : index
    %20 = vector.load %arg3[%c0_7, %c0_8, %c0_9] : memref<2x6x256xf32, #tpu.memory_space<vmem>>, vector<1x6x256xf32>
    %21 = vector.shape_cast %20 : vector<1x6x256xf32> to vector<6x256xf32>
    %22 = vector.shape_cast %19 : vector<6x256xf32> to vector<1x6x256xf32>
    tpu.vector_store %arg3[%c0_7, %c0_8, %c0_9], %22 {strides = array<i32>} : memref<2x6x256xf32, #tpu.memory_space<vmem>>, vector<1x6x256xf32>,
    %23 = vector.extract_strided_slice %2 {offsets = [1, 0, 0], sizes = [1, 3, 290], strides = [1, 1, 1]} : vector<2x3x290xf32> to vector<1x3x290xf32>
    %24 = vector.shape_cast %23 : vector<1x3x290xf32> to vector<3x290xf32>
    %25 = vector.extract_strided_slice %24 {offsets = [0, 0], sizes = [3, 256], strides = [1, 1]} : vector<3x290xf32> to vector<3x256xf32>
    %26 = vector.extract_strided_slice %24 {offsets = [0, 1], sizes = [3, 256], strides = [1, 1]} : vector<3x290xf32> to vector<3x256xf32>
    %27 = vector.extract_strided_slice %24 {offsets = [0, 2], sizes = [3, 256], strides = [1, 1]} : vector<3x290xf32> to vector<3x256xf32>
    %28 = vector.extract_strided_slice %24 {offsets = [0, 16], sizes = [3, 256], strides = [1, 1]} : vector<3x290xf32> to vector<3x256xf32>
    %29 = vector.extract_strided_slice %24 {offsets = [0, 17], sizes = [3, 256], strides = [1, 1]} : vector<3x290xf32> to vector<3x256xf32>
    %30 = vector.extract_strided_slice %24 {offsets = [0, 18], sizes = [3, 256], strides = [1, 1]} : vector<3x290xf32> to vector<3x256xf32>
    %31 = vector.extract_strided_slice %24 {offsets = [0, 32], sizes = [3, 256], strides = [1, 1]} : vector<3x290xf32> to vector<3x256xf32>
    %32 = vector.extract_strided_slice %24 {offsets = [0, 33], sizes = [3, 256], strides = [1, 1]} : vector<3x290xf32> to vector<3x256xf32>
    %33 = vector.extract_strided_slice %24 {offsets = [0, 34], sizes = [3, 256], strides = [1, 1]} : vector<3x290xf32> to vector<3x256xf32>
    %34 = tpu.concatenate %25, %26, %27, %28, %29, %30, %31, %32, %33 in 0 : vector<3x256xf32>, vector<3x256xf32>, vector<3x256xf32>, vector<3x256xf32>, vector<3x256xf32>, vector<3x256xf32>, vector<3x256xf32>, vector<3x256xf32>, vector<3x256xf32> -> vector<27x256xf32>
    %cst_10 = arith.constant dense<0.000000e+00> : vector<6x256xf32>
    %35 = tpu.matmul %3, %34, %cst_10 {dimension_numbers = #tpu.dot_dimension_numbers<[1], [0], [0], [1], [0, 0, 1, 1], [], []>} : vector<6x27xf32>, vector<27x256xf32>, vector<6x256xf32> -> vector<6x256xf32>
    %36 = vector.broadcast %4 : vector<6x1xf32> to vector<6x256xf32>
    %37 = arith.addf %35, %36 : vector<6x256xf32>
    %c1 = arith.constant 1 : index
    %c0_11 = arith.constant 0 : index
    %c0_12 = arith.constant 0 : index
    %38 = vector.load %arg3[%c1, %c0_11, %c0_12] : memref<2x6x256xf32, #tpu.memory_space<vmem>>, vector<1x6x256xf32>
    %39 = vector.shape_cast %38 : vector<1x6x256xf32> to vector<6x256xf32>
    %40 = vector.shape_cast %37 : vector<6x256xf32> to vector<1x6x256xf32>
    tpu.vector_store %arg3[%c1, %c0_11, %c0_12], %40 {strides = array<i32>} : memref<2x6x256xf32, #tpu.memory_space<vmem>>, vector<1x6x256xf32>,
    return
  }
}

</mosaic_0001>

<bundles_post_ra>
// kernel: conv2d_pallas.1
= control target key start
LH: loop header
LB: loop body
LE: loop exit
PB: predicated region body
PF: predicated region fallthrough
CT: control target
= control target key end

     0   :  { %v432_v0 = vmov 0.0   ;;  %s433_s14 = smov 96   ;;  %s434_s15 = smov 110   ;;  %v441_v36 = vmov 0   ;;  %vm129_vm0 = vcmask 769024   ;;  %vm132_vm1 = vcmask 1042432   ;;  %s662_s0 = inlined_call_operand.vmem [shape: f32[2,3,256], index: 0, kind: input, shape index: {}]   ;;  %s663_s2 = inlined_call_operand.vmem [shape: f32[6,1], index: 2, kind: input, shape index: {}]   ;;  %s664_s1 = inlined_call_operand.vmem [shape: f32[6,27], index: 1, kind: input, shape index: {}]   ;;  %s665_s3 = inlined_call_operand.vmem [shape: f32[2,6,256], index: 3, kind: output, shape index: {}]  }
   0x1   :  { %v97_v1 = vrot.slane %v432_v0, 6  ;;  %v83_v2 = vrot.slane %v432_v0, 1  ;;  %v467_v3 = vld [vmem:[%s662_s0] sm:$0x77]  ;;  %230 = vmatprep.mubr.f32.mxu0 %v432_v0  ;;  %397 = vmatprep.mubr.f32.mxu1 %v432_v0  ;;  %v482_v7 = vld [vmem:[%s662_s0 + $0x8] sm:$0x77] }
   0x2   :  { %v473_v4 = vcombine.high %v467_v3, %v467_v3  ;;  %v488_v8 = vcombine.high %v482_v7, %v482_v7  ;;  %s435_s18 = smov 94   ;;  %s436_s0 = smov 126   ;;  %v41_v12 = vrot.slane %v432_v0, 2  ;;  %v55_v14 = vrot.slane %v432_v0, 7  ;;  %429 = vset.pattern.permute.xlu0 %v441_v36  ;;  %v23_v39 = vld [vmem:[%s663_s2] sm:$0x3f] }
   0x3   :  { %102 = vrot.lane.b32.xlu1 %v97_v1, %s433_s14  ;;  %88 = vrot.lane.b32.xlu0 %v83_v2, %s434_s15  ;;  %s437_s19 = smov 112   ;;  %v81_v15 = vrot.slane %v467_v3, 1  ;;  %v95_v16 = vrot.slane %v467_v3, 6  ;;  %s438_s20 = smov 95   ;;  %v111_v18 = vrot.slane %v432_v0, 3  ;;  %v279_v21 = vrot.slane %v482_v7, 1 }
   0x4   :  { %v96_v5 = vrot.slane %v473_v4, 6  ;;  %v82_v6 = vrot.slane %v473_v4, 1  ;;  %v290_v9 = vrot.slane %v488_v8, 6  ;;  %v280_v10 = vrot.slane %v488_v8, 1  ;;  %s439_s21 = smov 111   ;;  %s440_s22 = smov 127  }
   0x5   :  { %v40_v11 = vrot.slane %v473_v4, 2  ;;  %v54_v13 = vrot.slane %v473_v4, 7  ;;  %v110_v17 = vrot.slane %v473_v4, 3  ;;  %v250_v19 = vrot.slane %v488_v8, 2 }
   0x6   :  { %v260_v20 = vrot.slane %v488_v8, 7  ;;  %v289_v22 = vrot.slane %v482_v7, 6  ;;  %v300_v23 = vrot.slane %v488_v8, 3  ;;  %v39_v24 = vrot.slane %v467_v3, 2 }
   0x7   :  { %100 = vrot.lane.b32.xlu1 %v96_v5, %s433_s14  ;;  %86 = vrot.lane.b32.xlu0 %v82_v6, %s434_s15  ;;  %v53_v25 = vrot.slane %v467_v3, 7  ;;  %v69_v26 = vrot.slane %v432_v0, 4  ;;  %v109_v27 = vrot.slane %v467_v3, 3  ;;  %v249_v28 = vrot.slane %v482_v7, 2 }
   0x8   :  { %v259_v29 = vrot.slane %v482_v7, 7  ;;  %v299_v30 = vrot.slane %v482_v7, 3  ;;  %v67_v31 = vrot.slane %v467_v3, 4  ;;  %v269_v32 = vrot.slane %v482_v7, 4 }
   0x9   :  { %v26_v33 = vrot.slane %v473_v4, 5  ;;  %v27_v34 = vrot.slane %v432_v0, 5  ;;  %v240_v35 = vrot.slane %v488_v8, 5  ;;  %v25_v37 = vrot.slane %v467_v3, 5 }
   0xa   :  { %v239_v38 = vrot.slane %v482_v7, 5  ;;  %vm104_vm2 = vcmask 785408   ;;  %vm90_vm3 = vcmask 900096   ;;  %vm118_vm4 = vcmask 777216  }
   0xb   :  { %127 = vrot.lane.b32.xlu1 %v432_v0, %s435_s18  ;;  %125 = vrot.lane.b32.xlu0 %v473_v4, %s435_s18  ;;  %vm147_vm5 = vcmask 1041408   ;;  %vm150_vm6 = vcmask 1044480   ;;  %vm62_vm7 = vcmask 916480   ;;  %vm76_vm8 = vcmask 908288  }
   0xc   :  { %vm48_vm9 = vcmask 1031168   ;;  %vm138_vm10 = vcmask 1040384   ;;  %vm141_vm11 = vcmask 1043456   ;;  %vm144_vm12 = vcmask 1046528  }
   0xd   :  { %vm34_vm13 = vcmask 1039360   ;;  %vm135_vm14 = vcmask 1045504   ;;  %vm158_vm15 = vcmask 220160  }
   0xf   :  { %293 = vrot.lane.b32.xlu1 %v290_v9, %s433_s14  ;;  %283 = vrot.lane.b32.xlu0 %v280_v10, %s434_s15 }
  0x13   :  { %311 = vrot.lane.b32.xlu0 %v488_v8, %s435_s18  ;;  %44 = vrot.lane.b32.xlu1 %v40_v11, %s436_s0 }
  0x17   :  { %46 = vrot.lane.b32.xlu0 %v41_v12, %s436_s0  ;;  %58 = vrot.lane.b32.xlu1 %v54_v13, %s437_s19 }
  0x1b   :  { %60 = vrot.lane.b32.xlu0 %v55_v14, %s437_s19  ;;  %84 = vrot.lane.b32.xlu1 %v81_v15, %s434_s15 }
  0x1f   :  { %98 = vrot.lane.b32.xlu0 %v95_v16, %s433_s14  ;;  %114 = vrot.lane.b32.xlu1 %v110_v17, %s438_s20 }
  0x23   :  { %116 = vrot.lane.b32.xlu0 %v111_v18, %s438_s20  ;;  %123 = vrot.lane.b32.xlu1 %v467_v3, %s435_s18 }
  0x27   :  { %253 = vrot.lane.b32.xlu0 %v250_v19, %s436_s0  ;;  %263 = vrot.lane.b32.xlu1 %v260_v20, %s437_s19 }
  0x2b   :  { %281 = vrot.lane.b32.xlu0 %v279_v21, %s434_s15  ;;  %291 = vrot.lane.b32.xlu1 %v289_v22, %s433_s14 }
  0x2f   :  { %303 = vrot.lane.b32.xlu0 %v300_v23, %s438_s20  ;;  %309 = vrot.lane.b32.xlu1 %v482_v7, %s435_s18 }
  0x33   :  { %42 = vrot.lane.b32.xlu0 %v39_v24, %s436_s0  ;;  %56 = vrot.lane.b32.xlu1 %v53_v25, %s437_s19 }
  0x37   :  { %72 = vrot.lane.b32.xlu0 %v473_v4, %s439_s21  ;;  %74 = vrot.lane.b32.xlu1 %v69_v26, %s439_s21 }
  0x3b   :  { %112 = vrot.lane.b32.xlu0 %v109_v27, %s438_s20  ;;  %251 = vrot.lane.b32.xlu1 %v249_v28, %s436_s0 }
  0x3f   :  { %261 = vrot.lane.b32.xlu0 %v259_v29, %s437_s19  ;;  %273 = vrot.lane.b32.xlu1 %v488_v8, %s439_s21 }
  0x43   :  { %301 = vrot.lane.b32.xlu0 %v299_v30, %s438_s20  ;;  %70 = vrot.lane.b32.xlu1 %v67_v31, %s439_s21 }
  0x47   :  { %271 = vrot.lane.b32.xlu0 %v269_v32, %s439_s21  ;;  %30 = vrot.lane.b32.xlu1 %v26_v33, %s440_s22 }
  0x4b   :  { %32 = vrot.lane.b32.xlu0 %v27_v34, %s440_s22  ;;  %243 = vrot.lane.b32.xlu1 %v240_v35, %s440_s22 }
  0x4f   :  { %28 = vrot.lane.b32.xlu0 %v25_v37, %s440_s22  ;;  %241 = vrot.lane.b32.xlu1 %v239_v38, %s440_s22 }
  0x53   :  { %155 = vperm.xlu0 %429, %v23_v39  }
  0x75   :  { %v103_v40 = vpop.permute.xlu1 %102  ;;  %v89_v41 = vpop.permute.xlu0 %88 }
  0x79   :  { %v101_v42 = vpop.permute.xlu1 %100  ;;  %v555_v43 = vpop.permute.xlu0 %86 }
  0x7a   :  { %v106_v58 = vsel %vm104_vm2, %v101_v42, %v103_v40  ;;  %v92_v59 = vsel %vm90_vm3, %v555_v43, %v89_v41 }
  0x7b   :  { %v149_v0 = vsel %vm147_vm5, %v92_v59, %v106_v58 }
  0x7d   :  { %v128_v44 = vpop.permute.xlu1 %127  ;;  %v126_v45 = vpop.permute.xlu0 %125 }
  0x7e   :  { %v131_v46 = vsel %vm129_vm0, %v126_v45, %v128_v44 }
  0x7f   :  { %411 = vmatprep.subr.msk.mxu0 %vm132_vm1, %v131_v46 }
  0x81   :  { %v559_v47 = vpop.permute.xlu1 %293  ;;  %v561_v48 = vpop.permute.xlu0 %283 }
  0x82   :  { %v296_v10 = vsel %vm104_vm2, %v559_v47, %v103_v40  ;;  %v286_v11 = vsel %vm90_vm3, %v561_v48, %v89_v41 }
  0x83   :  { %v326_v16 = vsel %vm147_vm5, %v286_v11, %v296_v10 }
  0x85   :  { %v312_v49 = vpop.permute.xlu0 %311  ;;  %v563_v50 = vpop.permute.xlu1 %44 }
  0x86   :  { %v314_v51 = vsel %vm129_vm0, %v312_v49, %v128_v44 }
  0x87   :  { %414 = vmatprep.subr.msk.mxu1 %vm132_vm1, %v314_v51 }
  0x89   :  { %v47_v52 = vpop.permute.xlu0 %46  ;;  %v567_v53 = vpop.permute.xlu1 %58 }
  0x8a   :  { %v50_v24 = vsel %vm48_vm9, %v563_v50, %v47_v52 }
  0x8d   :  { %v61_v54 = vpop.permute.xlu0 %60  ;;  %v85_v55 = vpop.permute.xlu1 %84 }
  0x8e   :  { %v64_v20 = vsel %vm62_vm7, %v567_v53, %v61_v54  ;;  %v91_v27 = vsel %vm90_vm3, %v85_v55, %v555_v43 }
  0x8f   :  { %v140_v26 = vsel %vm138_vm10, %v50_v24, %v64_v20 }
  0x91   :  { %v99_v56 = vpop.permute.xlu0 %98  ;;  %v115_v57 = vpop.permute.xlu1 %114 }
  0x92   :  { %v105_v25 = vsel %vm104_vm2, %v99_v56, %v101_v42 }
  0x93   :  { %v148_v32 = vsel %vm147_vm5, %v91_v27, %v105_v25 }
  0x95   :  { %v117_v60 = vpop.permute.xlu0 %116  ;;  %v124_v61 = vpop.permute.xlu1 %123 }
  0x96   :  { %v120_v62 = vsel %vm118_vm4, %v115_v57, %v117_v60  ;;  %v130_v63 = vsel %vm129_vm0, %v124_v61, %v126_v45 }
  0x97   :  { %412 = vmatpush1.msk.msra.mxu0 %vm132_vm1, %v130_v63  ;;  %v152_v1 = vsel %vm150_vm6, %v149_v0, %v120_v62 }
  0x98   :  { %192 = vmatprep.subr.mxu0 %v152_v1 }
  0x99   :  { %v577_v2 = vpop.permute.xlu0 %253  ;;  %v264_v5 = vpop.permute.xlu1 %263 }
  0x9a   :  { %v256_v35 = vsel %vm48_vm9, %v577_v2, %v47_v52  ;;  %v266_v36 = vsel %vm62_vm7, %v264_v5, %v61_v54 }
  0x9b   :  { %v320_v44 = vsel %vm138_vm10, %v256_v35, %v266_v36 }
  0x9d   :  { %v282_v6 = vpop.permute.xlu0 %281  ;;  %v292_v9 = vpop.permute.xlu1 %291 }
  0x9e   :  { %v285_v40 = vsel %vm90_vm3, %v282_v6, %v561_v48  ;;  %v295_v41 = vsel %vm104_vm2, %v292_v9, %v559_v47 }
  0x9f   :  { %v325_v47 = vsel %vm147_vm5, %v285_v40, %v295_v41 }
  0xa1   :  { %v304_v12 = vpop.permute.xlu0 %303  ;;  %v310_v13 = vpop.permute.xlu1 %309 }
  0xa2   :  { %v306_v14 = vsel %vm118_vm4, %v304_v12, %v117_v60  ;;  %v313_v15 = vsel %vm129_vm0, %v310_v13, %v312_v49 }
  0xa3   :  { %415 = vmatpush1.msk.msra.mxu1 %vm132_vm1, %v313_v15  ;;  %v328_v17 = vsel %vm150_vm6, %v326_v16, %v306_v14 }
  0xa4   :  { %359 = vmatprep.subr.mxu1 %v328_v17 }
  0xa5   :  { %v43_v18 = vpop.permute.xlu0 %42  ;;  %v57_v19 = vpop.permute.xlu1 %56 }
  0xa6   :  { %v49_v42 = vsel %vm48_vm9, %v43_v18, %v563_v50  ;;  %v63_v43 = vsel %vm62_vm7, %v57_v19, %v567_v53 }
  0xa7   :  { %v139_v51 = vsel %vm138_vm10, %v49_v42, %v63_v43 }
  0xa9   :  { %v73_v21 = vpop.permute.xlu0 %72  ;;  %v75_v22 = vpop.permute.xlu1 %74 }
  0xaa   :  { %v78_v23 = vsel %vm76_vm8, %v73_v21, %v75_v22 }
  0xab   :  { %v143_v30 = vsel %vm141_vm11, %v140_v26, %v78_v23 }
  0xac   :  { %v146_v34 = vsel %vm144_vm12, %v143_v30, %v92_v59 }
  0xad   :  { %v113_v28 = vpop.permute.xlu0 %112  ;;  %v252_v29 = vpop.permute.xlu1 %251 }
  0xae   :  { %v119_v31 = vsel %vm118_vm4, %v113_v28, %v115_v57  ;;  %v255_v57 = vsel %vm48_vm9, %v252_v29, %v577_v2 }
  0xaf   :  { %v151_v33 = vsel %vm150_vm6, %v148_v32, %v119_v31 }
  0xb0   :  { %193 = vmatpush1.msra.mxu0 %v151_v33 }
  0xb1   :  { %v262_v37 = vpop.permute.xlu0 %261  ;;  %194 = vmatprep.subr.mxu0 %v146_v34  ;;  %v274_v38 = vpop.permute.xlu1 %273 }
  0xb2   :  { %v276_v39 = vsel %vm76_vm8, %v274_v38, %v75_v22  ;;  %v265_v54 = vsel %vm62_vm7, %v262_v37, %v264_v5 }
  0xb3   :  { %v322_v49 = vsel %vm141_vm11, %v320_v44, %v276_v39  ;;  %v319_v60 = vsel %vm138_vm10, %v255_v57, %v265_v54 }
  0xb4   :  { %v324_v56 = vsel %vm144_vm12, %v322_v49, %v286_v11 }
  0xb5   :  { %v302_v45 = vpop.permute.xlu0 %301  ;;  %v71_v46 = vpop.permute.xlu1 %70 }
  0xb6   :  { %v305_v52 = vsel %vm118_vm4, %v302_v45, %v304_v12  ;;  %v77_v48 = vsel %vm76_vm8, %v71_v46, %v73_v21 }
  0xb7   :  { %v327_v50 = vsel %vm150_vm6, %v325_v47, %v305_v52  ;;  %v142_v53 = vsel %vm141_vm11, %v139_v51, %v77_v48 }
  0xb8   :  { %360 = vmatpush1.msra.mxu1 %v327_v50  ;;  %v145_v55 = vsel %vm144_vm12, %v142_v53, %v91_v27 }
  0xb9   :  { %v272_v58 = vpop.permute.xlu0 %271  ;;  %195 = vmatpush1.msra.mxu0 %v145_v55  ;;  %361 = vmatprep.subr.mxu1 %v324_v56  ;;  %v31_v59 = vpop.permute.xlu1 %30 }
  0xba   :  { %v275_v61 = vsel %vm76_vm8, %v272_v58, %v274_v38 }
  0xbb   :  { %v321_v62 = vsel %vm141_vm11, %v319_v60, %v275_v61 }
  0xbc   :  { %v323_v63 = vsel %vm144_vm12, %v321_v62, %v285_v40 }
  0xbd   :  { %v33_v0 = vpop.permute.xlu0 %32  ;;  %362 = vmatpush1.msra.mxu1 %v323_v63  ;;  %v244_v1 = vpop.permute.xlu1 %243 }
  0xbe   :  { %v36_v5 = vsel %vm34_vm13, %v31_v59, %v33_v0  ;;  %v246_v2 = vsel %vm34_vm13, %v244_v1, %v33_v0 }
  0xbf   :  { %v134_v6 = vsel %vm132_vm1, %v473_v4, %v36_v5  ;;  %v316_v9 = vsel %vm132_vm1, %v488_v8, %v246_v2  ;;  %v22_v8 = vld [vmem:[%s664_s1] sm:$0x3f] }
  0xc0   :  { %v137_v10 = vsel %vm135_vm14, %v134_v6, %v50_v24  ;;  %v318_v11 = vsel %vm135_vm14, %v316_v9, %v256_v35 }
  0xc1   :  { %v29_v12 = vpop.permute.xlu0 %28  ;;  %196 = vmatprep.subr.mxu0 %v137_v10  ;;  %363 = vmatprep.subr.mxu1 %v318_v11  ;;  %v242_v13 = vpop.permute.xlu1 %241 }
  0xc2   :  { %v35_v14 = vsel %vm34_vm13, %v29_v12, %v31_v59  ;;  %v245_v15 = vsel %vm34_vm13, %v242_v13, %v244_v1 }
  0xc3   :  { %v133_v16 = vsel %vm132_vm1, %v467_v3, %v35_v14  ;;  %v315_v4 = vsel %vm132_vm1, %v482_v7, %v245_v15 }
  0xc4   :  { %v136_v17 = vsel %vm135_vm14, %v133_v16, %v49_v42  ;;  %v317_v18 = vsel %vm135_vm14, %v315_v4, %v255_v57 }
  0xc5   :  { %197 = vmatpush1.msra.mxu0 %v136_v17  ;;  %364 = vmatpush1.msra.mxu1 %v317_v18 }
  0xc6   :  { %413 = vmatmul.mubr.msk.f32.vlgmr.msra.gmra.mxu0 %vm158_vm15, %v22_v8  ;;  %416 = vmatmul.mubr.msk.f32.vlgmr.msra.gmra.mxu1 %vm158_vm15, %v22_v8 }
  0xce   :  { %v156_v19 = vpop.permute.xlu0 %155 }
 0x186   :  { %v232_v20 = vpop.f32.mrf.mxu0  ;;  %v399_v21 = vpop.f32.mrf.mxu1 }
 0x187   :  { %v233_v3 = vadd.f32 %v232_v20, %v156_v19  ;;  %v400_v22 = vadd.f32 %v399_v21, %v156_v19 }
 0x188   :  { %v234_v23 = vpop.f32.mrf.mxu0  ;;  %v401_v7 = vpop.f32.mrf.mxu1 }
 0x189   :  { %237 = vst [vmem:[%s665_s3] sm:$0x3f] %v233_v3  ;;  %417 = vst [vmem:[%s665_s3 + $0x10] sm:$0x3f] %v400_v22  ;;  %v235_v24 = vadd.f32 %v234_v23, %v156_v19  ;;  %v402_v25 = vadd.f32 %v401_v7, %v156_v19 }
 0x18b   :  { %238 = vst [vmem:[%s665_s3 + $0x8] sm:$0x3f] %v235_v24  ;;  %418 = vst [vmem:[%s665_s3 + $0x18] sm:$0x3f] %v402_v25 }

</bundles_post_ra>
